<compile_context>
chip_gen: v7x
topology: tpu7x:2x2x1
jax: 0.10.0
libtpu: 0.0.40
codegen_flags: <defaults>
</compile_context>

<pallas_src>
import math
from functools import partial

import jax
import jax.numpy as jnp
from jax import lax
from jax.experimental import pallas as pl
from jax.experimental.pallas import tpu as pltpu

# ---------------------------------------------------------------------------
# Configuration (small synthetic sizes consistent with the module structure)
# ---------------------------------------------------------------------------
ROI_OUT = 8              # config['roi_layer_output']
SAMPLING = 2             # fixed samples-per-bin (see TODO in roi_align)
STRIDE = 16              # config['roi_spatial_scale'] (feature-map stride)
C3 = 32                  # 3D-stream backbone output channels (stand-in)
C2 = 32                  # 2D-stream backbone output channels (stand-in)
FC_INPUT_DIM = C3 + C2   # config['fc_input_dim']  (= 64 here)
PP = ROI_OUT * ROI_OUT   # RoI bins per channel (reference path only)
HID = 128                # Learner hidden width


def _round_up(x, m):
    return ((x + m - 1) // m) * m


# ---------------------------------------------------------------------------
# Pallas kernel: fused Learner MLP + sigmoid head.
# The RoI spatial pool & concat happen upstream (folded into the RoIAlign
# contraction), and Linear2/Linear3 are folded into one weight at trace time
# (exact in eval mode: Dropout = identity, no ReLU between them — matches
# Learner.forward which skips the Sequential's second ReLU).  Body:
#     bf16 [TR,64] @ bf16 [64,128]  (f32 acc)  -> +b1 -> ReLU
#     f32  [8,128] x f32 [TR,128]   (NT dot, contract over 128) -> +b23 -> sigmoid
# Per-tile output is a lane-dense [8, TR] block: row 0 is the real score,
# rows 1..7 are sigmoid(b23) padding garbage and are sliced off by the wrapper.
# ---------------------------------------------------------------------------
def _head_kernel(x_ref, w1_ref, b1_ref, w23r_ref, b23_ref, out_ref):
    # x_ref   : [TR, C_IN]  bf16  (spatially pooled RoI features, 3d || 2d)
    # w1_ref  : [C_IN, 128] bf16
    # b1_ref  : [1, 128]    f32
    # w23r_ref: [8, 128]    f32   (row 0 = (w2 @ w3).T, rows 1..7 = 0 padding)
    # b23_ref : [1]         f32   SMEM scalar (= b2 @ w3 + b3)
    # out_ref : [8, TR]     f32
    h = jnp.dot(x_ref[...], w1_ref[...], preferred_element_type=jnp.float32)
    h = jnp.maximum(h + b1_ref[...], 0.0)                        # [TR, 128] f32
    # NT contraction over the 128-dim: no materialized h.T (no XLU transpose).
    scores = lax.dot_general(
        w23r_ref[...], h,
        dimension_numbers=(((1,), (1,)), ((), ())),
        preferred_element_type=jnp.float32)                      # [8, TR]
    out_ref[...] = jax.nn.sigmoid(scores + b23_ref[0])


def _pick_tile(r, tr_max=1024):
    """Pick TR (multiple of 128, <= tr_max) preferring >=2 grid tiles (v7x)."""
    r128 = _round_up(max(r, 1), 128)
    if r128 >= 2 * tr_max:
        tr = tr_max
    elif r128 >= 2 * 128:
        tr = _round_up(r128 // 2, 128)     # split so both v7x TCs get work
    else:
        tr = r128                          # single 128-row tile
    r_pad = _round_up(r128, tr)
    return tr, r_pad, r_pad // tr


def fused_head(xpool, w1, b1, w2, b2, w3, b3, *, tr_max=1024):
    """xpool: [R, FC_INPUT_DIM] pooled RoI features -> [R, 1] sigmoid scores."""
    R, C = xpool.shape

    # ---- trace-time weight folding (exact in eval mode) --------------------
    # Linear(128,32) -> Dropout(identity) -> Linear(32,1): fold into one layer.
    w23 = w2 @ w3                                                 # [128, 1]
    b23 = (b2 @ w3 + b3).reshape(1).astype(jnp.float32)           # [1]
    w23r = jnp.zeros((8, HID), jnp.float32).at[0].set(w23[:, 0])  # [8, 128]
    w1b = w1.astype(jnp.bfloat16)                                 # [C, 128]

    # ---- R tiling: bf16 activations, lane-dense f32 output -----------------
    tr, r_pad, num_tiles = _pick_tile(R, tr_max)
    x = xpool.astype(jnp.bfloat16)
    if r_pad != R:
        x = jnp.pad(x, ((0, r_pad - R), (0, 0)))

    out = pl.pallas_call(
        _head_kernel,
        out_shape=jax.ShapeDtypeStruct((8, r_pad), jnp.float32),
        grid_spec=pltpu.PrefetchScalarGridSpec(
            num_scalar_prefetch=0,
            grid=(num_tiles,),
            in_specs=[
                pl.BlockSpec((tr, C), lambda i: (i, 0)),     # activations tiled over R
                pl.BlockSpec((C, HID), lambda i: (0, 0)),    # VMEM-resident weights
                pl.BlockSpec((1, HID), lambda i: (0, 0)),
                pl.BlockSpec((8, HID), lambda i: (0, 0)),
                pl.BlockSpec(memory_space=pltpu.MemorySpace.SMEM),  # b23 scalar
            ],
            out_specs=pl.BlockSpec((8, tr), lambda i: (0, i)),
        ),
        compiler_params=pltpu.CompilerParams(
            dimension_semantics=("parallel",)),
    )(x, w1b, b1, w23r, b23)

    # Row 0 holds the real scores; rows 1..7 are sigmoid(b23) padding -> drop.
    return out[0, :R].reshape(R, 1)


# ---------------------------------------------------------------------------
# Plain-JAX glue: RoIAlign (aligned=True) as separable bilinear-weight matmuls
# (runs on the MXU instead of scattered gathers)
# ---------------------------------------------------------------------------
def _bilinear_axis_weights(start, end, out_size, sampling, extent):
    """Averaged separable bilinear sampling weights for one axis: [P, extent]."""
    S = sampling
    bin_sz = (end - start) / out_size
    pidx = jnp.arange(out_size, dtype=jnp.float32)[:, None]      # [P,1]
    sidx = jnp.arange(S, dtype=jnp.float32)[None, :]             # [1,S]
    coords = (start + (pidx + (sidx + 0.5) / S) * bin_sz).reshape(-1)   # [P*S]
    valid = ((coords >= -1.0) & (coords <= float(extent))).astype(jnp.float32)
    c = jnp.clip(coords, 0.0, float(extent - 1))
    c0 = jnp.floor(c).astype(jnp.int32)
    c1 = jnp.minimum(c0 + 1, extent - 1)
    frac = c - c0.astype(jnp.float32)
    grid = jnp.arange(extent, dtype=jnp.int32)[None, :]          # [1, E]
    w = ((1.0 - frac)[:, None] * (grid == c0[:, None]).astype(jnp.float32)
         + frac[:, None] * (grid == c1[:, None]).astype(jnp.float32))
    w = w * valid[:, None]                                       # [P*S, E]
    return w.reshape(out_size, S, extent).mean(axis=1)           # [P, E]


def _box_axis_weights(box, out_size, spatial_scale, Hf, Wf, sampling):
    x1 = box[1] * spatial_scale - 0.5    # aligned=True
    y1 = box[2] * spatial_scale - 0.5
    x2 = box[3] * spatial_scale - 0.5
    y2 = box[4] * spatial_scale - 0.5
    wy = _bilinear_axis_weights(y1, y2, out_size, sampling, Hf)   # [P, Hf]
    wx = _bilinear_axis_weights(x1, x2, out_size, sampling, Wf)   # [P, Wf]
    return wy, wx


def roi_align(feat, boxes, out_size, spatial_scale, sampling=SAMPLING):
    """feat: [B,C,Hf,Wf]; boxes: [R,5] -> [R,C,P,P] (reference path only)."""
    # TODO(synk): torchvision sampling_ratio=0 uses an adaptive per-RoI sample
    # grid (data-dependent shapes); a fixed SxS-sample-per-bin grid is used here.
    _, _, Hf, Wf = feat.shape
    wy, wx = jax.vmap(lambda b: _box_axis_weights(
        b, out_size, spatial_scale, Hf, Wf, sampling))(boxes)     # [R,P,Hf],[R,P,Wf]
    bidx = boxes[:, 0].astype(jnp.int32)
    feat_r = jnp.take(feat, bidx, axis=0)                         # [R,C,Hf,Wf]
    return jnp.einsum('rph,rchw,rqw->rcpq', wy, feat_r, wx)


def roi_align_spatial_mean(feat, boxes, out_size, spatial_scale, sampling=SAMPLING):
    """RoIAlign followed by mean over the PxP bins, with the bin-mean folded
    into the separable bilinear weights: mean_pq RoIAlign = (mean_p wy) F (mean_q wx).
    No [R,C,P,P] intermediate -> [R, C] directly (hot path)."""
    _, _, Hf, Wf = feat.shape

    def one_box(box):
        wy, wx = _box_axis_weights(box, out_size, spatial_scale, Hf, Wf, sampling)
        return wy.mean(axis=0), wx.mean(axis=0)                   # [Hf], [Wf]

    wym, wxm = jax.vmap(one_box)(boxes)                           # [R,Hf],[R,Wf]
    bidx = boxes[:, 0].astype(jnp.int32)
    feat_r = jnp.take(feat, bidx, axis=0)                         # [R,C,Hf,Wf]
    return jnp.einsum('rh,rchw,rw->rc', wym, feat_r, wxm)         # [R, C]


# ---------------------------------------------------------------------------
# Plain-JAX glue: deterministic backbone stand-ins
# ---------------------------------------------------------------------------
# TODO(synk): BackboneI3D / Backbone2DResNet are external pretrained CNNs (weights
# unavailable in-script); stand-ins = stride-16 spatial avg pool + 1x1 channel proj.
def backbone3d_stub(x, w_proj):                     # x: [N,3,T,H,W], w_proj: [3,C3]
    n, c, t, h, w = x.shape
    xp = x.reshape(n, c, t, h // STRIDE, STRIDE, w // STRIDE, STRIDE).mean(axis=(4, 6))
    return jnp.einsum('ncthw,cd->ndthw', xp, w_proj)


def backbone2d_stub(x, w_proj):                     # x: [N,3,H,W], w_proj: [3,C2]
    n, c, h, w = x.shape
    xp = x.reshape(n, c, h // STRIDE, STRIDE, w // STRIDE, STRIDE).mean(axis=(3, 5))
    return jnp.einsum('nchw,cd->ndhw', xp, w_proj)


# ---------------------------------------------------------------------------
# Full forward (mirrors TwoStreamVDRegression.forward, eval mode)
# ---------------------------------------------------------------------------
@partial(jax.jit, static_argnums=(3,))
def two_stream_vd_regression(x1, x2, bbox, num_tubes, params):
    n = x1.shape[0]
    _batch = n // num_tubes  # computed as in the torch forward; unused downstream

    feat3d = backbone3d_stub(x1, params['w_3d_proj'])     # [N, C3, T, H/16, W/16]
    feat2d = backbone2d_stub(x2, params['w_2d_proj'])     # [N, C2, H/16, W/16]

    # SingleRoIExtractor3D(with_temporal_pool=True): temporal mean, then RoIAlign.
    # The subsequent AdaptiveAvgPool3d((1,None,None)) is then the identity, and
    # the AdaptiveAvgPool over the PxP bins is folded into the RoI contraction.
    feat3d_tp = feat3d.mean(axis=2)                       # [N, C3, H/16, W/16]
    pool3d = roi_align_spatial_mean(feat3d_tp, bbox, ROI_OUT, 1.0 / STRIDE)  # [R,C3]
    pool2d = roi_align_spatial_mean(feat2d, bbox, ROI_OUT, 1.0 / STRIDE)     # [R,C2]

    xpool = jnp.concatenate([pool3d, pool2d], axis=1)     # [R, 64]

    # fused Pallas hot path: Learner MLP + sigmoid
    return fused_head(xpool,
                      params['w1'], params['b1'],
                      params['w2'], params['b2'],
                      params['w3'], params['b3'])


# ---------------------------------------------------------------------------
# Pure-JAX reference (unfused, full [R,C,P,P] RoI path) for correctness check
# ---------------------------------------------------------------------------
@jax.jit
def reference_forward(x1, x2, bbox, params):
    feat3d = backbone3d_stub(x1, params['w_3d_proj']).mean(axis=2)
    feat2d = backbone2d_stub(x2, params['w_2d_proj'])
    roi3d = roi_align(feat3d, bbox, ROI_OUT, 1.0 / STRIDE)
    roi2d = roi_align(feat2d, bbox, ROI_OUT, 1.0 / STRIDE)
    r = roi3d.shape[0]
    f3 = roi3d.reshape(r, C3, PP).mean(-1)
    f2 = roi2d.reshape(r, C2, PP).mean(-1)
    x = jnp.concatenate([f3, f2], axis=-1)
    h = jnp.maximum(x @ params['w1'] + params['b1'], 0.0)
    h = h @ params['w2'] + params['b2']        # no ReLU (Learner.forward skips it)
    h = h @ params['w3'] + params['b3']
    return jax.nn.sigmoid(h)


# ---------------------------------------------------------------------------
# Deterministic parameter initialization (Learner: xavier_normal weights)
# ---------------------------------------------------------------------------
def init_params(key):
    ks = jax.random.split(key, 8)

    def xavier_t(k, fan_in, fan_out):
        # PyTorch Linear weight is [out, in]; F.linear does x @ W.T, store W.T.
        std = math.sqrt(2.0 / (fan_in + fan_out))
        return std * jax.random.normal(k, (fan_in, fan_out), jnp.float32)

    return {
        'w_3d_proj': 0.1 * jax.random.normal(ks[0], (3, C3), jnp.float32),
        'w_2d_proj': 0.1 * jax.random.normal(ks[1], (3, C2), jnp.float32),
        'w1': xavier_t(ks[2], FC_INPUT_DIM, 128),
        'b1': 0.05 * jax.random.normal(ks[3], (1, 128), jnp.float32),
        'w2': xavier_t(ks[4], 128, 32),
        'b2': 0.05 * jax.random.normal(ks[5], (1, 32), jnp.float32),
        'w3': xavier_t(ks[6], 32, 1),
        'b3': 0.05 * jax.random.normal(ks[7], (1, 1), jnp.float32),
    }


# ---------------------------------------------------------------------------
if __name__ == "__main__":
    key = jax.random.PRNGKey(0)
    k_x1, k_x2, k_b1, k_b2, k_p = jax.random.split(key, 5)

    batch, num_tubes = 2, 4
    n = batch * num_tubes        # 8 tube-clips
    t, h, w = 8, 64, 64

    x1 = jax.random.normal(k_x1, (n, 3, t, h, w), jnp.float32)   # 3D stream input
    x2 = jax.random.normal(k_x2, (n, 3, h, w), jnp.float32)      # 2D stream key frames

    # one bbox per tube: (batch_index, x1, y1, x2, y2) in image coordinates
    bidx = jnp.arange(n, dtype=jnp.float32)[:, None]
    xy_tl = jax.random.uniform(k_b1, (n, 2), minval=0.0, maxval=24.0)
    wh = jax.random.uniform(k_b2, (n, 2), minval=16.0, maxval=40.0)
    bbox = jnp.concatenate([bidx, xy_tl, xy_tl + wh], axis=1)    # [8, 5]

    params = init_params(k_p)

    out = two_stream_vd_regression(x1, x2, bbox, num_tubes, params)
    out = jax.block_until_ready(out)

    assert out.shape == (n, 1), out.shape
    assert bool(jnp.all((out >= 0.0) & (out <= 1.0))), "sigmoid range violated"

    ref = jax.block_until_ready(reference_forward(x1, x2, bbox, params))
    max_err = float(jnp.max(jnp.abs(out - ref)))
    assert max_err < 5e-3, f"kernel/reference mismatch: {max_err}"

    print("KERNEL_OK")
</pallas_src>

<mosaic_0001>
module attributes {stable_mosaic.version = 11 : i64} {
  func.func @_head_kernel(%arg0: i32, %arg1: memref<128x64xbf16, #tpu.memory_space<vmem>>, %arg2: memref<64x128xbf16, #tpu.memory_space<vmem>>, %arg3: memref<1x128xf32, #tpu.memory_space<vmem>>, %arg4: memref<8x128xf32, #tpu.memory_space<vmem>>, %arg5: memref<1xf32, #tpu.memory_space<smem>>, %arg6: memref<8x128xf32, #tpu.memory_space<vmem>>) attributes {dimension_semantics = [#tpu.dimension_semantics<parallel>], iteration_bounds = array<i64: 1>, scalar_prefetch = 0 : i64, scratch_operands = 0 : i64, tpu.core_type = #tpu.core_type<tc>, window_params = [{transform_indices = @transform_0, window_bounds = array<i64: 128, 64>}, {pipeline_mode = #tpu.pipeline_mode<synchronous>, transform_indices = @transform_1, window_bounds = array<i64: 64, 128>}, {pipeline_mode = #tpu.pipeline_mode<synchronous>, transform_indices = @transform_2, window_bounds = array<i64: 1, 128>}, {pipeline_mode = #tpu.pipeline_mode<synchronous>, transform_indices = @transform_3, window_bounds = array<i64: 8, 128>}, {transform_indices = @transform_4, window_bounds = array<i64: 1>}, {transform_indices = @transform_5, window_bounds = array<i64: 8, 128>}]} {
    %c0 = arith.constant 0 : index
    %c0_0 = arith.constant 0 : index
    %0 = vector.load %arg1[%c0, %c0_0] : memref<128x64xbf16, #tpu.memory_space<vmem>>, vector<128x64xbf16>
    %c0_1 = arith.constant 0 : index
    %c0_2 = arith.constant 0 : index
    %1 = vector.load %arg2[%c0_1, %c0_2] : memref<64x128xbf16, #tpu.memory_space<vmem>>, vector<64x128xbf16>
    %cst = arith.constant dense<0.000000e+00> : vector<128x128xf32>
    %2 = tpu.matmul %0, %1, %cst {dimension_numbers = #tpu.dot_dimension_numbers<[1], [0], [0], [1], [0, 0, 1, 1], [], []>} : vector<128x64xbf16>, vector<64x128xbf16>, vector<128x128xf32> -> vector<128x128xf32>
    %c0_3 = arith.constant 0 : index
    %c0_4 = arith.constant 0 : index
    %3 = vector.load %arg3[%c0_3, %c0_4] : memref<1x128xf32, #tpu.memory_space<vmem>>, vector<1x128xf32>
    %4 = vector.broadcast %3 : vector<1x128xf32> to vector<128x128xf32>
    %5 = arith.addf %2, %4 : vector<128x128xf32>
    %cst_5 = arith.constant 0.000000e+00 : f32
    %6 = vector.broadcast %cst_5 : f32 to vector<128x128xf32>
    %7 = arith.maximumf %5, %6 : vector<128x128xf32>
    %c0_6 = arith.constant 0 : index
    %c0_7 = arith.constant 0 : index
    %8 = vector.load %arg4[%c0_6, %c0_7] : memref<8x128xf32, #tpu.memory_space<vmem>>, vector<8x128xf32>
    %cst_8 = arith.constant dense<0.000000e+00> : vector<8x128xf32>
    %9 = tpu.matmul %8, %7, %cst_8 {dimension_numbers = #tpu.dot_dimension_numbers<[1], [1], [0], [0], [0, 0, 1, 0], [], []>} : vector<8x128xf32>, vector<128x128xf32>, vector<8x128xf32> -> vector<8x128xf32>
    %c0_9 = arith.constant 0 : index
    %10 = memref.load %arg5[%c0_9] : memref<1xf32, #tpu.memory_space<smem>>
    %11 = vector.broadcast %10 : f32 to vector<8x128xf32>
    %12 = arith.addf %9, %11 : vector<8x128xf32>
    %13 = arith.negf %12 : vector<8x128xf32>
    %14 = math.exp %13 : vector<8x128xf32>
    %cst_10 = arith.constant 1.000000e+00 : f32
    %15 = vector.broadcast %cst_10 : f32 to vector<8x128xf32>
    %16 = arith.addf %15, %14 : vector<8x128xf32>
    %17 = arith.divf %15, %16 : vector<8x128xf32>
    %c0_11 = arith.constant 0 : index
    %c0_12 = arith.constant 0 : index
    %18 = vector.load %arg6[%c0_11, %c0_12] : memref<8x128xf32, #tpu.memory_space<vmem>>, vector<8x128xf32>
    tpu.vector_store %arg6[%c0_11, %c0_12], %17 {strides = array<i32>} : memref<8x128xf32, #tpu.memory_space<vmem>>, vector<8x128xf32>,
    return
  }
  func.func @transform_0(%arg0: i32) -> (i32, i32) {
    %c0_i32 = arith.constant 0 : i32
    %c0_i32_0 = arith.constant 0 : i32
    return %arg0, %c0_i32 : i32, i32
  }
  func.func @transform_1(%arg0: i32) -> (i32, i32) {
    %c0_i32 = arith.constant 0 : i32
    %c0_i32_0 = arith.constant 0 : i32
    %c0_i32_1 = arith.constant 0 : i32
    return %c0_i32, %c0_i32_0 : i32, i32
  }
  func.func @transform_2(%arg0: i32) -> (i32, i32) {
    %c0_i32 = arith.constant 0 : i32
    %c0_i32_0 = arith.constant 0 : i32
    %c0_i32_1 = arith.constant 0 : i32
    return %c0_i32, %c0_i32_0 : i32, i32
  }
  func.func @transform_3(%arg0: i32) -> (i32, i32) {
    %c0_i32 = arith.constant 0 : i32
    %c0_i32_0 = arith.constant 0 : i32
    %c0_i32_1 = arith.constant 0 : i32
    return %c0_i32, %c0_i32_0 : i32, i32
  }
  func.func @transform_4(%arg0: i32) -> i32 {
    %c0_i32 = arith.constant 0 : i32
    %c0_i32_0 = arith.constant 0 : i32
    return %c0_i32 : i32
  }
  func.func @transform_5(%arg0: i32) -> (i32, i32) {
    %c0_i32 = arith.constant 0 : i32
    %c0_i32_0 = arith.constant 0 : i32
    return %c0_i32, %arg0 : i32, i32
  }
}

</mosaic_0001>

<bundles_post_ra>
// kernel: two_stream_vd_regression.1
= control target key start
LH: loop header
LB: loop body
LE: loop exit
PB: predicated region body
PF: predicated region fallthrough
CT: control target
= control target key end

     0   :  { %vm117_vm0 = vcmask 523264   ;;  %v492_v12 = vmov 0.0|0.0   ;;  %vm493_vm1 = vmmov 0   ;;  %v494_v13 = vmov 0.0   ;;  %s589_s1 = inlined_call_operand.vmem [shape: bf16[64,128], index: 1, kind: input, shape index: {}]   ;;  %s590_s0 = inlined_call_operand.vmem [shape: bf16[128,64], index: 0, kind: input, shape index: {}]   ;;  %s591_s2 = inlined_call_operand.vmem [shape: f32[1,128], index: 2, kind: input, shape index: {}]   ;;  %s592_s3 = inlined_call_operand.vmem [shape: f32[8,128], index: 3, kind: input, shape index: {}]   ;;  %s593_s4 = inlined_call_operand.<no memory space> [shape: f32[1], index: 4, kind: input, shape index: {}]   ;;  %s594_s5 = inlined_call_operand.vmem [shape: f32[8,128], index: 5, kind: output, shape index: {}]  }
   0x1   :  { %v476_v0 = vld [vmem:[%s589_s1] sm:$0xff]   ;;  %v477_v1 = vld [vmem:[%s589_s1 + $0x8] sm:$0xff]   ;;  %v478_v2 = vld [vmem:[%s589_s1 + $0x10] sm:$0xff]   ;;  %449 = vmatprep.subr.bf16.mxu1 %v492_v12  ;;  %446 = vmatprep.mubr.msk.f32.mxu1 %vm493_vm1, %v494_v13 }
   0x2   :  { %390 = vmatprep.subr.bf16.mxu0 %v476_v0  ;;  %v480_v3 = vld [vmem:[%s590_s0] sm:$0xff]   ;;  %v479_v4 = vld [vmem:[%s589_s1 + $0x18] sm:$0xff]   ;;  %v481_v5 = vld [vmem:[%s590_s0 + $0x8] sm:$0xff]  }
   0x3   :  { %391 = vmatpush3.bf16.msra.mxu0 %v476_v0  ;;  %398 = vmatprep.mubr.msk.bf16.mxu0 %vm117_vm0, %v480_v3  ;;  %v482_v6 = vld [vmem:[%s590_s0 + $0x10] sm:$0xff]   ;;  %v483_v7 = vld [vmem:[%s590_s0 + $0x18] sm:$0xff]   ;;  %v484_v8 = vld [vmem:[%s590_s0 + $0x20] sm:$0xff]  }
   0x4   :  { %392 = vmatprep.subr.bf16.mxu0 %v477_v1  ;;  %v485_v9 = vld [vmem:[%s590_s0 + $0x28] sm:$0xff]   ;;  %v486_v10 = vld [vmem:[%s590_s0 + $0x30] sm:$0xff]   ;;  %v487_v11 = vld [vmem:[%s590_s0 + $0x38] sm:$0xff]  }
   0x5   :  { %v339_v14 = vld [vmem:[%s591_s2] ss:$0 sm:$0xff] }
   0x7   :  { %393 = vmatpush3.bf16.msra.mxu0 %v477_v1 }
   0x8   :  { %394 = vmatprep.subr.bf16.mxu0 %v478_v2 }
   0xb   :  { %395 = vmatpush3.bf16.msra.mxu0 %v478_v2 }
   0xc   :  { %396 = vmatprep.subr.bf16.mxu0 %v479_v4 }
   0xf   :  { %397 = vmatpush3.bf16.msra.mxu0 %v479_v4 }
  0x12   :  { %399 = vmatmul.mubr.msk.bf16.vlgmr.msra.gmra.mrb[0].mxu0 %vm117_vm0, %v481_v5 }
  0x13   :  { %402 = vmatprep.mubr.msk.bf16.mxu0 %vm117_vm0, %v482_v6 }
  0x1a   :  { %403 = vmatmul.mubr.msk.bf16.gmra.mrb[4].mxu0 %vm117_vm0, %v483_v7  ;;  %v255_v7 = vld [vmem:[%s592_s3] sm:$0xff] }
  0x1b   :  { %406 = vmatprep.mubr.msk.bf16.mxu0 %vm117_vm0, %v484_v8  ;;  %v257_v8 = vstv %s593_s4 }
  0x22   :  { %407 = vmatmul.mubr.msk.bf16.gmra.mrb[8].mxu0 %vm117_vm0, %v485_v9 }
  0x23   :  { %410 = vmatprep.mubr.msk.bf16.mxu0 %vm117_vm0, %v486_v10 }
  0x2a   :  { %411 = vmatmul.mubr.msk.bf16.gmra.mrb[12].mxu0 %vm117_vm0, %v487_v11 }
  0xe5   :  { %v400_v15 = vpop.f32.mrb[0].mxu0 }
  0xe6   :  { %v185_v16 = vadd.f32 %v400_v15, %v339_v14  ;;  %v176_v17 = vpop.f32.mrb[1].mxu0 }
  0xe7   :  { %v177_v18 = vadd.f32 %v339_v14, %v176_v17  ;;  %v401_v19 = vpop.f32.mrb[2].mxu0 }
  0xe8   :  { %v188_v20 = vadd.f32 %v401_v19, %v339_v14  ;;  %v179_v21 = vpop.f32.mrb[3].mxu0  ;;  %v241_v23 = vmax.f32 %v185_v16, 0.0 }
  0xe9   :  { %v180_v22 = vadd.f32 %v339_v14, %v179_v21  ;;  %v239_v25 = vmax.f32 %v177_v18, 0.0 }
  0xea   :  { %v242_v24 = vmax.f32 %v188_v20, 0.0 }
  0xeb   :  { %v240_v26 = vmax.f32 %v180_v22, 0.0 }
  0xec   :  { %v453_v27 = vpack.c.bf16 %v242_v24, %v241_v23 }
  0xed   :  { %v450_v28 = vpack.c.bf16 %v240_v26, %v239_v25  ;;  %v404_v29 = vpop.f32.mrb[4].mxu0 }
  0xee   :  { %v201_v30 = vadd.f32 %v404_v29, %v339_v14  ;;  %v192_v31 = vpop.f32.mrb[5].mxu0 }
  0xef   :  { %451 = vmatpush3.bf16.xpose.msra.mxu1 %v450_v28  ;;  %v193_v32 = vadd.f32 %v339_v14, %v192_v31  ;;  %v405_v33 = vpop.f32.mrb[6].mxu0 }
  0xf0   :  { %v245_v34 = vmax.f32 %v201_v30, 0.0  ;;  %v204_v35 = vadd.f32 %v405_v33, %v339_v14  ;;  %v195_v36 = vpop.f32.mrb[7].mxu0  ;;  %452 = vmatprep.subr.bf16.mxu1 %v492_v12 }
  0xf1   :  { %v243_v37 = vmax.f32 %v193_v32, 0.0  ;;  %v196_v38 = vadd.f32 %v339_v14, %v195_v36 }
  0xf2   :  { %v246_v39 = vmax.f32 %v204_v35, 0.0 }
  0xf3   :  { %v244_v40 = vmax.f32 %v196_v38, 0.0 }
  0xf4   :  { %v459_v41 = vpack.c.bf16 %v246_v39, %v245_v34 }
  0xf5   :  { %v456_v42 = vpack.c.bf16 %v244_v40, %v243_v37  ;;  %v408_v43 = vpop.f32.mrb[8].mxu0 }
  0xf6   :  { %v217_v44 = vadd.f32 %v408_v43, %v339_v14  ;;  %v208_v45 = vpop.f32.mrb[9].mxu0 }
  0xf7   :  { %454 = vmatpush3.bf16.xpose.msra.mxu1 %v453_v27  ;;  %v209_v46 = vadd.f32 %v339_v14, %v208_v45  ;;  %v409_v47 = vpop.f32.mrb[10].mxu0 }
  0xf8   :  { %455 = vmatprep.subr.bf16.mxu1 %v492_v12  ;;  %v249_v48 = vmax.f32 %v217_v44, 0.0  ;;  %v220_v49 = vadd.f32 %v409_v47, %v339_v14  ;;  %v211_v50 = vpop.f32.mrb[11].mxu0 }
  0xf9   :  { %v247_v51 = vmax.f32 %v209_v46, 0.0  ;;  %v212_v52 = vadd.f32 %v339_v14, %v211_v50 }
  0xfa   :  { %v250_v53 = vmax.f32 %v220_v49, 0.0 }
  0xfb   :  { %v248_v54 = vmax.f32 %v212_v52, 0.0 }
  0xfc   :  { %v465_v55 = vpack.c.bf16 %v250_v53, %v249_v48 }
  0xfd   :  { %v462_v56 = vpack.c.bf16 %v248_v54, %v247_v51  ;;  %v412_v57 = vpop.f32.mrb[12].mxu0 }
  0xfe   :  { %v233_v58 = vadd.f32 %v412_v57, %v339_v14  ;;  %v224_v59 = vpop.f32.mrb[13].mxu0 }
  0xff   :  { %457 = vmatpush3.bf16.xpose.msra.mxu1 %v456_v42  ;;  %v225_v60 = vadd.f32 %v339_v14, %v224_v59  ;;  %v413_v61 = vpop.f32.mrb[14].mxu0 }
 0x100   :  { %458 = vmatprep.subr.bf16.mxu1 %v492_v12  ;;  %v253_v62 = vmax.f32 %v233_v58, 0.0  ;;  %v236_v63 = vadd.f32 %v413_v61, %v339_v14  ;;  %v227_v0 = vpop.f32.mrb[15].mxu0 }
 0x101   :  { %v251_v1 = vmax.f32 %v225_v60, 0.0  ;;  %v228_v2 = vadd.f32 %v339_v14, %v227_v0 }
 0x102   :  { %v254_v3 = vmax.f32 %v236_v63, 0.0 }
 0x103   :  { %v252_v4 = vmax.f32 %v228_v2, 0.0 }
 0x104   :  { %v471_v5 = vpack.c.bf16 %v254_v3, %v253_v62 }
 0x105   :  { %v468_v6 = vpack.c.bf16 %v252_v4, %v251_v1 }
 0x107   :  { %460 = vmatpush3.bf16.xpose.msra.mxu1 %v459_v41 }
 0x108   :  { %461 = vmatprep.subr.bf16.mxu1 %v492_v12 }
 0x10f   :  { %463 = vmatpush3.bf16.xpose.msra.mxu1 %v462_v56 }
 0x110   :  { %464 = vmatprep.subr.bf16.mxu1 %v492_v12 }
 0x117   :  { %466 = vmatpush3.bf16.xpose.msra.mxu1 %v465_v55 }
 0x118   :  { %467 = vmatprep.subr.bf16.mxu1 %v492_v12 }
 0x11f   :  { %469 = vmatpush3.bf16.xpose.msra.mxu1 %v468_v6 }
 0x120   :  { %470 = vmatprep.subr.bf16.mxu1 %v492_v12 }
 0x127   :  { %472 = vmatpush3.bf16.xpose.msra.mxu1 %v471_v5 }
 0x12e   :  { %447 = vmatmul.mubr.f32.vlgmr.msra.gmra.mrb[0].mxu1 %v255_v7 }
 0x201   :  { %v324_v9 = vpop.f32.mrb[0].mxu1 }
 0x202   :  { %v325_v10 = vadd.f32 %v324_v9, %v257_v8  ;;  %v448_v11 = vpop.f32.mrb[1].mxu1 }
 0x204   :  { %v360_v13 = vmul.f32 -1.442695, %v325_v10 }
 0x206   :  { %488 = vpow2.f32 %v360_v13 }
 0x210   :  { %v489_v14 = vpop.eup %488 }
 0x211   :  { %v331_v15 = vadd.f32 1.0, %v489_v14 }
 0x213   :  { %490 = vrcp.f32 %v331_v15 }
 0x21d   :  { %v491_v16 = vpop.eup %490 }
 0x21e   :  { %334 = vst [vmem:[%s594_s5] sm:$0xff] %v491_v16 }

</bundles_post_ra>
